<compile_context>
chip_gen: v7x
topology: tpu7x:2x2x1
jax: 0.10.0
libtpu: 0.0.40
codegen_flags: <defaults>
</compile_context>

<pallas_src>
import math

import jax
import jax.numpy as jnp
from jax.experimental import pallas as pl
from jax.experimental.pallas import tpu as pltpu


def _round_up(x, m):
    return ((x + m - 1) // m) * m


def _single_k_kernel(b_ref, d_ref, c_ref, o_ref):
    """One (TR, TN) output tile for one sample; whole contraction in one block.

    b_ref is the scalar-prefetch batch index (used only in the index_maps).
    """
    o_ref[...] = jnp.dot(
        d_ref[...], c_ref[...], preferred_element_type=jnp.float32
    ).astype(o_ref.dtype)


def _multi_k_kernel(b_ref, d_ref, c_ref, o_ref):
    """Contraction tiled over the last grid axis; accumulate into o_ref
    (the output block is VMEM-resident across k, so no scratch is needed)."""
    k = pl.program_id(3)
    prod = jnp.dot(d_ref[...], c_ref[...], preferred_element_type=jnp.float32)

    @pl.when(k == 0)
    def _():
        o_ref[...] = prod.astype(o_ref.dtype)

    @pl.when(k > 0)
    def _():
        o_ref[...] = (o_ref[...] + prod).astype(o_ref.dtype)


def p_sparse_forward(synthesis_dict, sparse_code, batch_order,
                     *, tr=256, tn=512, tk=512):
    """synthesis_dict: (row_sample R, col_synthesis_dict C) f32
    sparse_code:     (batch_num, num_sample S, C, col_sample N) f32
    batch_order:     scalar int index into batch_num
    returns:         (S, R, N) f32   ==  bmm(D.expand(S,R,C), sparse_code[b])
    """
    R, C = synthesis_dict.shape
    _, S, C2, N = sparse_code.shape
    assert C == C2, (C, C2)
    out_dtype = synthesis_dict.dtype

    # Scalar-prefetch operand (lands in SMEM, read inside the index_maps).
    b_idx = jnp.asarray(batch_order, dtype=jnp.int32).reshape((1,))

    # ---- tile selection ----------------------------------------------------
    # Full dim when small (block == full array dim is always legal); otherwise
    # MXU/lane-friendly caps.  R/N may be ragged (boundary padding is read as
    # don't-care and discarded on writeback); the contraction dim K must be
    # covered exactly, so zero-pad it only when it is tiled unevenly.
    TR = R if R <= tr else tr
    TN = N if N <= tn else tn
    TK = C if C <= tk else tk

    d_in, c_in = synthesis_dict, sparse_code
    if C > TK and C % TK != 0:
        C_eff = _round_up(C, TK)
        d_in = jnp.pad(d_in, ((0, 0), (0, C_eff - C)))
        c_in = jnp.pad(c_in, ((0, 0), (0, 0), (0, C_eff - C), (0, 0)))
    else:
        C_eff = C

    nR = pl.cdiv(R, TR)
    nN = pl.cdiv(N, TN)
    nK = C_eff // TK

    if nK == 1:
        # Common case (small sparse-dict atom count): pure MXU push + store.
        grid = (nR, S, nN)
        d_map = lambda i, s, j, b: (i, 0)
        c_map = lambda i, s, j, b: (b[0], s, 0, j)
        o_map = lambda i, s, j, b: (s, i, j)
        kernel = _single_k_kernel
        dims = ("parallel", "parallel", "parallel")
    else:
        grid = (nR, S, nN, nK)
        d_map = lambda i, s, j, k, b: (i, k)
        c_map = lambda i, s, j, k, b: (b[0], s, k, j)
        o_map = lambda i, s, j, k, b: (s, i, j)
        kernel = _multi_k_kernel
        dims = ("parallel", "parallel", "parallel", "arbitrary")

    # VMEM limit from the actual working set (double-buffered inputs +
    # resident f32 output tile) with headroom; capped for v7x's 64 MiB core.
    itemsize = jnp.dtype(out_dtype).itemsize
    work = (2 * (TR * TK + TK * TN)) * itemsize + TR * TN * 4
    vmem_limit = int(min(32 << 20, max(16 << 20, 2 * work + (4 << 20))))

    return pl.pallas_call(
        kernel,
        out_shape=jax.ShapeDtypeStruct((S, R, N), out_dtype),
        grid_spec=pltpu.PrefetchScalarGridSpec(
            num_scalar_prefetch=1,
            grid=grid,
            in_specs=[
                # Dictionary tile: block index constant over s and j
                # -> fetched once per (i, k), stays VMEM-resident.
                pl.BlockSpec((TR, TK), d_map),
                # Sparse codes: batch + sample dims squeezed; batch index
                # comes from the prefetched scalar, so no HBM gather.
                pl.BlockSpec((None, None, TK, TN), c_map),
            ],
            out_specs=pl.BlockSpec((None, TR, TN), o_map),
        ),
        compiler_params=pltpu.CompilerParams(
            dimension_semantics=dims,
            vmem_limit_bytes=vmem_limit,
        ),
    )(b_idx, d_in, c_in)


def reference_forward(synthesis_dict, sparse_code, batch_order):
    codes = sparse_code[batch_order]                      # (S, C, N)
    return jnp.einsum("rc,scn->srn", synthesis_dict, codes)


if __name__ == "__main__":
    key = jax.random.PRNGKey(0)
    k1, k2 = jax.random.split(key)

    # Small shapes consistent with the module's constructor arguments.
    batch_num, num_sample = 4, 8
    row_sample, col_synthesis_dict, col_sample = 32, 16, 16

    stdv = 1.0 / math.sqrt(batch_num)
    sparse_code = jax.random.uniform(
        k1, (batch_num, num_sample, col_synthesis_dict, col_sample),
        dtype=jnp.float32, minval=-stdv, maxval=stdv)
    synthesis_dict = jax.random.normal(
        k2, (row_sample, col_synthesis_dict), dtype=jnp.float32)
    batch_order = jnp.int32(2)

    out = p_sparse_forward(synthesis_dict, sparse_code, batch_order)
    out = jax.block_until_ready(out)

    ref = reference_forward(synthesis_dict, sparse_code, batch_order)
    assert out.shape == (num_sample, row_sample, col_sample), out.shape
    assert jnp.allclose(out, ref, rtol=1e-5, atol=1e-5), \
        float(jnp.max(jnp.abs(out - ref)))

    print("KERNEL_OK")
</pallas_src>

<mosaic_0001>
module attributes {stable_mosaic.version = 11 : i64} {
  func.func @_single_k_kernel(%arg0: i32, %arg1: i32, %arg2: i32, %arg3: memref<1xi32, #tpu.memory_space<smem>>, %arg4: memref<32x16xf32, #tpu.memory_space<vmem>>, %arg5: memref<1x1x16x16xf32, #tpu.memory_space<vmem>>, %arg6: memref<1x32x16xf32, #tpu.memory_space<vmem>>) attributes {dimension_semantics = [#tpu.dimension_semantics<parallel>, #tpu.dimension_semantics<parallel>, #tpu.dimension_semantics<parallel>], iteration_bounds = array<i64: 1, 8, 1>, scalar_prefetch = 1 : i64, scratch_operands = 0 : i64, tpu.core_type = #tpu.core_type<tc>, window_params = [{transform_indices = @transform_0, window_bounds = array<i64: 32, 16>}, {transform_indices = @transform_1, window_bounds = array<i64: 1, 1, 16, 16>}, {transform_indices = @transform_2, window_bounds = array<i64: 1, 32, 16>}]} {
    %c0 = arith.constant 0 : index
    %c0_0 = arith.constant 0 : index
    %0 = vector.load %arg4[%c0, %c0_0] : memref<32x16xf32, #tpu.memory_space<vmem>>, vector<32x16xf32>
    %c0_1 = arith.constant 0 : index
    %c0_2 = arith.constant 0 : index
    %c0_3 = arith.constant 0 : index
    %c0_4 = arith.constant 0 : index
    %1 = vector.load %arg5[%c0_1, %c0_2, %c0_3, %c0_4] : memref<1x1x16x16xf32, #tpu.memory_space<vmem>>, vector<1x1x16x16xf32>
    %2 = vector.shape_cast %1 : vector<1x1x16x16xf32> to vector<16x16xf32>
    %cst = arith.constant dense<0.000000e+00> : vector<32x16xf32>
    %3 = tpu.matmul %0, %2, %cst {dimension_numbers = #tpu.dot_dimension_numbers<[1], [0], [0], [1], [0, 0, 1, 1], [], []>} : vector<32x16xf32>, vector<16x16xf32>, vector<32x16xf32> -> vector<32x16xf32>
    %c0_5 = arith.constant 0 : index
    %c0_6 = arith.constant 0 : index
    %c0_7 = arith.constant 0 : index
    %4 = vector.load %arg6[%c0_5, %c0_6, %c0_7] : memref<1x32x16xf32, #tpu.memory_space<vmem>>, vector<1x32x16xf32>
    %5 = vector.shape_cast %4 : vector<1x32x16xf32> to vector<32x16xf32>
    %6 = vector.shape_cast %3 : vector<32x16xf32> to vector<1x32x16xf32>
    tpu.vector_store %arg6[%c0_5, %c0_6, %c0_7], %6 {strides = array<i32>} : memref<1x32x16xf32, #tpu.memory_space<vmem>>, vector<1x32x16xf32>,
    return
  }
  func.func @transform_0(%arg0: i32, %arg1: i32, %arg2: i32, %arg3: memref<1xi32, #tpu.memory_space<smem>>) -> (i32, i32) {
    %c0_i32 = arith.constant 0 : i32
    %c0_i32_0 = arith.constant 0 : i32
    return %arg0, %c0_i32 : i32, i32
  }
  func.func @transform_1(%arg0: i32, %arg1: i32, %arg2: i32, %arg3: memref<1xi32, #tpu.memory_space<smem>>) -> (i32, i32, i32, i32) {
    %c0 = arith.constant 0 : index
    %0 = memref.load %arg3[%c0] : memref<1xi32, #tpu.memory_space<smem>>
    %c0_i32 = arith.constant 0 : i32
    %c0_i32_0 = arith.constant 0 : i32
    return %0, %arg1, %c0_i32, %arg2 : i32, i32, i32, i32
  }
  func.func @transform_2(%arg0: i32, %arg1: i32, %arg2: i32, %arg3: memref<1xi32, #tpu.memory_space<smem>>) -> (i32, i32, i32) {
    %c0_i32 = arith.constant 0 : i32
    return %arg1, %arg0, %arg2 : i32, i32, i32
  }
}

</mosaic_0001>

<bundles_post_ra>
// kernel: tpu_custom_call.1
= control target key start
LH: loop header
LB: loop body
LE: loop exit
PB: predicated region body
PF: predicated region fallthrough
CT: control target
= control target key end

     0   :  { %s820_s0 = inlined_call_operand.<no memory space> [shape: s32[1], index: 0, kind: input, shape index: {}]   ;;  %s821_s1 = inlined_call_operand.vmem [shape: f32[32,16], index: 1, kind: input, shape index: {}]   ;;  %s822_s2 = inlined_call_operand.hbm [shape: f32[4,8,16,16], index: 2, kind: input, shape index: {}]   ;;  %s823_s3 = inlined_call_operand.vmem [shape: f32[8,32,16], index: 3, kind: output, shape index: {}]  }
   0x1   :  { %8 = sst [smem:[#allocation3]] %s820_s0 }
   0x2   :  { %9 = vsyncpa [#allocation5], 0 }
   0x3   :  { %11 = vsyncpa [#allocation5 + $0x1], 0  ;;  %s676_s14 = smov 0   ;;  %s678_s15 = smov 0  }
   0x4   :  { %s680_s16 = smov 0   ;;  %s682_s17 = smov 0  }
   0x5   :  { %s684_s18 = smov 0   ;;  %s686_s19 = smov 0  }
   0x6 LB: > { %s469_s0 = sadd.s32 4294967295, %s648_s19   ;;  %s32_s20 = sadd.s32 1, %s644_s18  ;;  %s648_s19 = sphi %s686_s19, %s17_s19   ;;  %s644_s18 = sphi %s684_s18, %s831_s18   ;;  %s640_s17 = sphi %s682_s17, %s830_s17   ;;  %s636_s16 = sphi %s680_s16, %s829_s16   ;;  %s632_s15 = sphi %s678_s15, %s828_s15   ;;  %s628_s14 = sphi %s676_s14, %s827_s14  }
   0x7   : > { %p34_p0 = scmp.ge.s32.totalorder %s32_s20, 8  ;;  %s66_s21 = sld [smem:[#allocation3]] }
   0x8   : > { %s75_s22 = sadd.s32 1, %s636_s16  ;;  %p82_p1 = scmp.ne.s32.totalorder %s636_s16, %s632_s15 }
   0x9   : > { %s833_s20 = smov (%p34_p0, %s32_s20), 0  ;;  %p83_p2 = scmp.eq.s32.totalorder %s648_s19, 0 }
   0xa   : > { %p88_p3 = scmp.ne.s32.totalorder %s632_s15, %s628_s14  ;;  %s69_s23 = ssub.s32 %s644_s18, %s833_s20 }
   0xb   : > { %p89_p4 = scmp.eq.s32.totalorder %s469_s0, 0  ;;  %p715_p5 = por %p83_p2, %p82_p1 }
   0xc   : > { %p517_p7 = scmp.lt.s32.totalorder %s648_s19, 8  ;;  %p73_p8 = scmp.eq.s32.totalorder %s69_s23, 0 }
   0xd   : > { %p719_p6 = por %p89_p4, %p88_p3  ;;  %s151_s26 = sand.u32 1, %s636_s16  }
   0xe   : > { %s474_s27 = sshll.u32 %s151_s26, 4  ;;  %s475_s29 = sshll.u32 %s644_s18, 1 }
   0xf   : > { %s726_s28 = scalar_select %p73_p8, %s636_s16, %s75_s22  }
  0x10   : > { %s476_s30 = sshll.u32 %s66_s21, 4  ;;  %s155_s4 = scalar_lea.vmem [#allocation4], %s474_s27 }
  0x11   : > { %s166_s5 = sshll.u32 %s155_s4, 4  ;;  %s163_s6 = sadd.s32 %s476_s30, %s475_s29  ;;  %s729_s5 = int_to_ptr.vmem [resolvable:$true] %s166_s5 }
  0x12   : > { %s477_s7 = sshll.u32 %s163_s6, 7  ;;  %p733_p9 = pnand %p517_p7, %p715_p5 }
  0x13   : > { %s740_s11 = scalar_lea.hbm %s822_s2, %s477_s7  ;;  %s742_s12 = scalar_lea.sflag [#allocation5], %s151_s26 }
  0x14   : > { %s568_s13 = scalar_lea.hbm %s740_s11, 256  ;;  %p570_p11 = pneg %p733_p9 }
  0x15   : > { %p569_p10 = scmp.ne.s32.totalorder %s740_s11, %s568_s13  ;;  %s573_s21 = scalar_lea.hbm %s822_s2, 8192 }
  0x16   : > { %p574_p0 = scmp.lt.u32.totalorder %s740_s11, %s822_s2  ;;  %p575_p1 = scmp.lt.u32.totalorder %s573_s21, %s568_s13 }
  0x17   : > { %p571_p12 = pnand %p570_p11, %p569_p10  ;;  %p577_p3 = scmp.lt.u32.totalorder %s568_s13, %s740_s11 }
  0x18   : > { %p576_p2 = por %p575_p1, %p574_p0 }
  0x19   : > { %p572_p13 = pneg %p571_p12 }
  0x1a   : > { %p578_p4 = por %p577_p3, %p576_p2 }
  0x1c   : > { %p579_p5 = pnand %p578_p4, %p572_p13 }
  0x1e   : > { %582 = shalt.err (!%p579_p5)
}
  0x1f   : > { %s583_s24 = scalar_lea.vmem %s729_s5, 256  ;;  %s650_s26 = smov [#allocation4]  }
  0x20   : > { %p584_p7 = scmp.ne.s32.totalorder %s729_s5, %s583_s24  ;;  %s588_s27 = sshll.u32 %s650_s26, 4  ;;  %s589_s27 = int_to_ptr.vmem [resolvable:$false] %s588_s27 }
  0x21   : > { %s590_s29 = scalar_lea.vmem %s589_s27, 512  ;;  %p591_p12 = scmp.lt.s32.totalorder %s729_s5, %s589_s27 }
  0x22   : > { %p586_p8 = pnand %p584_p7, %p570_p11  ;;  %p592_p0 = scmp.lt.s32.totalorder %s590_s29, %s583_s24 }
  0x24   : > { %p587_p10 = pneg %p586_p8  ;;  %p593_p1 = por %p592_p0, %p591_p12 }
  0x26   : > { %p594_p2 = pnand %p593_p1, %p587_p10 }
  0x28   : > { %597 = shalt.err (!%p594_p2)
}
  0x29   : > { %s651_s30 = smov 128   ;;  %s652_s4 = smov 8  }
  0x2a   : > { %516 = dma.hbm_to_vmem [thread:$0]  (!%p733_p9), %s740_s11, 256, %s729_s5, %s742_s12, %s651_s30, %s651_s30, %s652_s4  }
  0x2b   : > { %p478_p11 = scmp.ge.s32.totalorder %s648_s19, 1  ;;  %p174_p13 = scmp.lt.s32.totalorder %s648_s19, 9 }
  0x2d   : > { %p175_p3 = pnand %p478_p11, %p174_p13 }
  0x2e   : > { %s180_s6 = sand.u32 (!%p175_p3), 1, %s632_s15  }
  0x2f   : > { %178 = sbr.rel (%p175_p3) target bundleno = 276 (0x114), region = 28  ;;  %s479_s7 = sshll.u32 (!%p175_p3), %s180_s6, 4 }
  0x30   : > { %s181_s9 = scalar_lea.sflag (!%p175_p3), [#allocation5], %s180_s6  ;;  %s184_s10 = scalar_lea.vmem (!%p175_p3), [#allocation4], %s479_s7 }
  0x36   : > { %623 = dma.done.wait (%p719_p6), %s181_s9, 256  }
  0x37   : > { %625 = vsyncadd (%p719_p6), %s181_s9, 4294967040  ;;  %vm243_vm0 = vcmask 130048   ;;  %v241_v0 = vld [vmem:[%s184_s10] sm:$0xff]  ;;  %v242_v1 = vld [vmem:[%s184_s10 + $0x8] sm:$0xff]  ;;  %p225_p6 = scmp.lt.s32.totalorder %s640_s17, 7 }
  0x38   : > { %v237_v2 = vld [vmem:[%s821_s1] sm:$0xff]  ;;  %v505_v3 = vpack.c.bf16 %v242_v1, %v241_v0  ;;  %v239_v4 = vld [vmem:[%s821_s1 + $0x10] sm:$0xff]  ;;  %v238_v5 = vld [vmem:[%s821_s1 + $0x8] sm:$0xff] }
  0x39   : > { %499 = vmatprep.mubr.msk.f32.mxu0 %vm243_vm0, %v237_v2  ;;  %502 = vmatprep.mubr.msk.f32.mxu1 %vm243_vm0, %v239_v4  ;;  %v240_v6 = vld [vmem:[%s821_s1 + $0x18] sm:$0xff]  ;;  %s835_s17 = smov (!%p225_p6, %s640_s17), 7 }
  0x3a   : > { %506 = vmatprep.subr.bf16.mxu0 %v505_v3  ;;  %509 = vmatprep.subr.bf16.mxu1 %v505_v3  ;;  %s488_s21 = sshll.u32 %s835_s17, 5 }
  0x3b   : > { %508 = vmatpush3.bf16.msra.mxu0 %v505_v3  ;;  %510 = vmatpush3.bf16.msra.mxu1 %v505_v3  ;;  %s235_s24 = scalar_lea.vmem %s823_s3, %s488_s21 }
  0x3e   : > { %500 = vmatmul.mubr.msk.f32.vlgmr.msra.gmra.mrb[0].mxu0 %vm243_vm0, %v238_v5  ;;  %503 = vmatmul.mubr.msk.f32.vlgmr.msra.gmra.mrb[0].mxu1 %vm243_vm0, %v240_v6 }
 0x111   : > { %v501_v7 = vpop.f32.mrb[0].mxu0  ;;  %v504_v8 = vpop.f32.mrb[0].mxu1 }
 0x112   : > { %342 = vst.msk [vmem:[%s235_s24 + $0x8] sm:$0xff] %vm243_vm0, %v501_v7  ;;  %344 = vst.msk [vmem:[%s235_s24 + $0x18] sm:$0xff] %vm243_vm0, %v504_v8  ;;  %v322_v9 = vpop.f32.mrb[1].mxu0  ;;  %v332_v10 = vpop.f32.mrb[1].mxu1 }
 0x113   : > { %341 = vst.msk [vmem:[%s235_s24] sm:$0xff] %vm243_vm0, %v322_v9  ;;  %343 = vst.msk [vmem:[%s235_s24 + $0x10] sm:$0xff] %vm243_vm0, %v332_v10 }
 0x114 PF: > { %s17_s19 = sadd.s32 1, %s648_s19   ;;  %s827_s14 = smov %s632_s15 }
 0x115   : > { %p14_p9 = scmp.ge.s32.totalorder %s17_s19, 10   ;;  %s828_s15 = smov %s636_s16 }
 0x116   : > { %s829_s16 = smov %s726_s28  ;;  %s830_s17 = smov %s644_s18 }
 0x117   : > { %s831_s18 = smov %s833_s20  ;;  %16 = sbr.rel (!%p14_p9) target bundleno = 6 (0x6), region = 71 }
 0x11e   :  { %381 = vsyncpa [#allocation5], 1 }
 0x11f   :  { %383 = vsyncpa [#allocation5 + $0x1], 1 }

</bundles_post_ra>
